<compile_context>
chip_gen: v7x
topology: tpu7x:2x2x1
jax: 0.10.0
libtpu: 0.0.40
codegen_flags: <defaults>
</compile_context>

<pallas_src>
import functools

import jax
import jax.numpy as jnp
from jax.experimental import pallas as pl
from jax.experimental.pallas import tpu as pltpu

BN_EPS = 1e-5
LEAKY_SLOPE = 0.2
LANE = 128          # pad channel (lane) dims to multiples of this
MAX_TILE_M = 512    # rows of the flattened output per grid step (review: 512-2048)
# Set to jnp.bfloat16 on v6e/v7x for 2-4x MXU throughput (accumulation stays f32 via
# preferred_element_type). Kept f32 here so the exact-tolerance validation holds.
MXU_DTYPE = jnp.float32
VMEM_LIMIT = 32 * 1024 * 1024


def _round_up(x, m):
    return (x + m - 1) // m * m


# ----------------------------- Pallas kernels ------------------------------

def _matmul_stats_kernel(p_ref, w_ref, y_ref, s_ref, ss_ref):
    """Pass 1: conv-as-matmul tile + per-tile partial BN statistics."""
    y = jnp.dot(p_ref[0], w_ref[0], preferred_element_type=jnp.float32)
    y_ref[0] = y
    s_ref[0, 0] = jnp.sum(y, axis=0, keepdims=True)
    ss_ref[0, 0] = jnp.sum(y * y, axis=0, keepdims=True)


def _affine_act_kernel(y_ref, scale_ref, bias_ref, out_ref, *, act):
    """Pass 2: folded BN (single FMA) + activation."""
    z = y_ref[0] * scale_ref[...] + bias_ref[...]
    if act == "leaky":
        z = jnp.where(z > 0, z, LEAKY_SLOPE * z)
    elif act == "relu":
        z = jnp.maximum(z, 0.0)
    elif act == "relu_sigmoid":
        z = jnp.maximum(z, 0.0)
        z = 1.0 / (1.0 + jnp.exp(-z))
    out_ref[0] = z


def _matmul_bias_leaky_kernel(p_ref, w_ref, b_ref, out_ref):
    """normalize=False path: conv + bias + LeakyReLU fused in one pass."""
    y = jnp.dot(p_ref[0], w_ref[0], preferred_element_type=jnp.float32)
    y = y + b_ref[...]
    out_ref[0] = jnp.where(y > 0, y, LEAKY_SLOPE * y)


# ------------------------- fused conv building blocks ----------------------

def _pallas_conv_bn_act(patches, w_mat, gamma, beta, act, n_valid_rows):
    """patches: (P, M, K), w_mat: (P, K, Cout).  Conv-as-matmul + train-mode BN
    (batch stats over all P * n_valid_rows real rows) + activation.  Returns
    (P, M, Cout) float32."""
    P, M, K = patches.shape
    Cout = w_mat.shape[-1]
    Cp = _round_up(Cout, LANE)
    tile_m = min(MAX_TILE_M, _round_up(M, 8))
    m_pad = _round_up(M, tile_m)
    nt = m_pad // tile_m

    patches = jnp.pad(patches, ((0, 0), (0, m_pad - M), (0, 0))).astype(MXU_DTYPE)
    w_p = jnp.pad(w_mat, ((0, 0), (0, 0), (0, Cp - Cout))).astype(MXU_DTYPE)

    flops = 2 * P * m_pad * K * Cp
    bytes_acc = 4 * (P * m_pad * K + P * K * Cp + P * m_pad * Cp)

    y, s_part, ss_part = pl.pallas_call(
        _matmul_stats_kernel,
        grid=(P, nt),
        in_specs=[
            pl.BlockSpec((1, tile_m, K), lambda p, i: (p, i, 0)),
            pl.BlockSpec((1, K, Cp), lambda p, i: (p, 0, 0)),
        ],
        out_specs=(
            pl.BlockSpec((1, tile_m, Cp), lambda p, i: (p, i, 0)),
            pl.BlockSpec((1, 1, 1, Cp), lambda p, i: (p, i, 0, 0)),
            pl.BlockSpec((1, 1, 1, Cp), lambda p, i: (p, i, 0, 0)),
        ),
        out_shape=(
            jax.ShapeDtypeStruct((P, m_pad, Cp), jnp.float32),
            jax.ShapeDtypeStruct((P, nt, 1, Cp), jnp.float32),
            jax.ShapeDtypeStruct((P, nt, 1, Cp), jnp.float32),
        ),
        compiler_params=pltpu.CompilerParams(
            dimension_semantics=("parallel", "parallel"),
            vmem_limit_bytes=VMEM_LIMIT),
        cost_estimate=pl.CostEstimate(flops=flops, transcendentals=0,
                                      bytes_accessed=bytes_acc),
    )(patches, w_p)

    # Tiny (C,)-sized finalize in the wrapper (zero-padded rows contribute 0 to sums).
    count = float(P * n_valid_rows)
    mean = jnp.sum(s_part, axis=(0, 1, 2)) / count
    var = jnp.maximum(jnp.sum(ss_part, axis=(0, 1, 2)) / count - mean * mean, 0.0)
    gamma_p = jnp.pad(gamma.astype(jnp.float32), (0, Cp - Cout), constant_values=1.0)
    beta_p = jnp.pad(beta.astype(jnp.float32), (0, Cp - Cout))
    scale = gamma_p * jax.lax.rsqrt(var + BN_EPS)
    bias = beta_p - mean * scale
    scale = scale.reshape(1, Cp)
    bias = bias.reshape(1, Cp)

    out = pl.pallas_call(
        functools.partial(_affine_act_kernel, act=act),
        grid=(P, nt),
        in_specs=[
            pl.BlockSpec((1, tile_m, Cp), lambda p, i: (p, i, 0)),
            pl.BlockSpec((1, Cp), lambda p, i: (0, 0)),
            pl.BlockSpec((1, Cp), lambda p, i: (0, 0)),
        ],
        out_specs=pl.BlockSpec((1, tile_m, Cp), lambda p, i: (p, i, 0)),
        out_shape=jax.ShapeDtypeStruct((P, m_pad, Cp), jnp.float32),
        compiler_params=pltpu.CompilerParams(
            dimension_semantics=("parallel", "parallel"),
            vmem_limit_bytes=VMEM_LIMIT),
    )(y, scale, bias)

    return out[:, :M, :Cout]


def _pallas_conv_bias_leaky(patches, w_mat, conv_bias):
    """Conv-as-matmul + bias + LeakyReLU (normalize=False path)."""
    P, M, K = patches.shape
    Cout = w_mat.shape[-1]
    Cp = _round_up(Cout, LANE)
    tile_m = min(MAX_TILE_M, _round_up(M, 8))
    m_pad = _round_up(M, tile_m)
    nt = m_pad // tile_m

    patches = jnp.pad(patches, ((0, 0), (0, m_pad - M), (0, 0))).astype(MXU_DTYPE)
    w_p = jnp.pad(w_mat, ((0, 0), (0, 0), (0, Cp - Cout))).astype(MXU_DTYPE)
    b_p = jnp.pad(conv_bias.astype(jnp.float32), (0, Cp - Cout)).reshape(1, Cp)

    out = pl.pallas_call(
        _matmul_bias_leaky_kernel,
        grid=(P, nt),
        in_specs=[
            pl.BlockSpec((1, tile_m, K), lambda p, i: (p, i, 0)),
            pl.BlockSpec((1, K, Cp), lambda p, i: (p, 0, 0)),
            pl.BlockSpec((1, Cp), lambda p, i: (0, 0)),
        ],
        out_specs=pl.BlockSpec((1, tile_m, Cp), lambda p, i: (p, i, 0)),
        out_shape=jax.ShapeDtypeStruct((P, m_pad, Cp), jnp.float32),
        compiler_params=pltpu.CompilerParams(
            dimension_semantics=("parallel", "parallel"),
            vmem_limit_bytes=VMEM_LIMIT),
        cost_estimate=pl.CostEstimate(
            flops=2 * P * m_pad * K * Cp, transcendentals=0,
            bytes_accessed=4 * (P * m_pad * (K + Cp) + P * K * Cp)),
    )(patches, w_p, b_p)
    return out[:, :M, :Cout]


# ------------------------------- UNet blocks -------------------------------

def downsample_block(x_nhwc, w_oihw, gamma=None, beta=None, conv_bias=None,
                     normalize=True):
    """Conv2d(k=4,s=2,p=1,bias=not normalize) [+ BN train-mode] + LeakyReLU(0.2)."""
    N, H, W, Cin = x_nhwc.shape
    Cout = w_oihw.shape[0]
    Ho, Wo = H // 2, W // 2
    M = N * Ho * Wo
    K = 16 * Cin

    xp = jnp.pad(x_nhwc, ((0, 0), (1, 1), (1, 1), (0, 0)))
    taps = []
    for kh in range(4):
        for kw in range(4):
            taps.append(xp[:, kh:kh + 2 * Ho:2, kw:kw + 2 * Wo:2, :])
    patches = jnp.stack(taps, axis=3).reshape(1, M, K)          # (1, M, 16*Cin)
    w_mat = jnp.transpose(w_oihw, (2, 3, 1, 0)).reshape(1, K, Cout)

    if normalize:
        out = _pallas_conv_bn_act(patches, w_mat, gamma, beta, "leaky", M)
    else:
        out = _pallas_conv_bias_leaky(patches, w_mat, conv_bias)
    return out.reshape(N, Ho, Wo, Cout)


def upsample_block(x_nhwc, w_pt, gamma, beta, apply_sigmoid=False):
    """ConvTranspose2d(k=4,s=2,p=1,bias=False) + BN(train) + ReLU [+ sigmoid].

    Decomposed into 4 output phases (r,s); each phase is a 2x2 stride-1 conv over
    the 1-padded input (no zero-dilated im2col)."""
    N, Hi, Wi, Cin = x_nhwc.shape
    Cout = w_pt.shape[1]
    M = N * Hi * Wi
    K = 4 * Cin

    xp = jnp.pad(x_nhwc, ((0, 0), (1, 1), (1, 1), (0, 0)))      # (N, Hi+2, Wi+2, Cin)
    patch_list, w_list = [], []
    for r in range(2):
        for s in range(2):
            taps, wt = [], []
            for a in range(2):
                for b in range(2):
                    taps.append(xp[:, r + a:r + a + Hi, s + b:s + b + Wi, :])
                    wt.append(w_pt[:, :, 3 - r - 2 * a, 3 - s - 2 * b])  # (Cin, Cout)
            patch_list.append(jnp.stack(taps, axis=3).reshape(M, K))
            w_list.append(jnp.stack(wt, axis=0).reshape(K, Cout))
    patches = jnp.stack(patch_list, axis=0)                     # (4, M, 4*Cin)
    w_mat = jnp.stack(w_list, axis=0)                           # (4, 4*Cin, Cout)

    act = "relu_sigmoid" if apply_sigmoid else "relu"
    out = _pallas_conv_bn_act(patches, w_mat, gamma, beta, act, M)  # (4, M, Cout)

    # Interleave the 4 phases back into (N, 2Hi, 2Wi, Cout).
    out = out.reshape(2, 2, N, Hi, Wi, Cout)
    out = jnp.transpose(out, (2, 3, 0, 4, 1, 5)).reshape(N, 2 * Hi, 2 * Wi, Cout)
    return out


def unet_generator_forward(x_nchw, params):
    """Returns (x_ct, x_mask), both NCHW, matching UnetGenerator.forward."""
    x = jnp.transpose(x_nchw, (0, 2, 3, 1))     # single NCHW->NHWC at the boundary
    feats = []
    for p in params["down"]:
        x = downsample_block(x, p["w"], p.get("gamma"), p.get("beta"),
                             p.get("bias"), p["normalize"])
        feats.append(x)

    def run_up(blocks):
        h = feats[-1]
        for i, p in enumerate(blocks):
            h = upsample_block(h, p["w"], p["gamma"], p["beta"], p["sigmoid"])
            if i < len(feats) - 1:
                h = jnp.concatenate([h, feats[-2 - i]], axis=-1)   # channel concat (NHWC)
        return h

    x_ct = run_up(params["up_ct"])
    x_mask = run_up(params["up_mask"])
    return (jnp.transpose(x_ct, (0, 3, 1, 2)),
            jnp.transpose(x_mask, (0, 3, 1, 2)))


# ----------------------------- pure-JAX reference --------------------------

def _bn_ref(y, gamma, beta):
    mean = jnp.mean(y, axis=(0, 1, 2), keepdims=True)
    var = jnp.mean((y - mean) ** 2, axis=(0, 1, 2), keepdims=True)
    y = (y - mean) * jax.lax.rsqrt(var + BN_EPS)
    return y * gamma.reshape(1, 1, 1, -1) + beta.reshape(1, 1, 1, -1)


def _down_ref(x, p):
    w_hwio = jnp.transpose(p["w"], (2, 3, 1, 0))
    y = jax.lax.conv_general_dilated(x, w_hwio, (2, 2), ((1, 1), (1, 1)),
                                     dimension_numbers=("NHWC", "HWIO", "NHWC"))
    if p["normalize"]:
        y = _bn_ref(y, p["gamma"], p["beta"])
    else:
        y = y + p["bias"].reshape(1, 1, 1, -1)
    return jnp.where(y > 0, y, LEAKY_SLOPE * y)


def _up_ref(x, p):
    w_flip = p["w"][:, :, ::-1, ::-1]
    w_hwio = jnp.transpose(w_flip, (2, 3, 0, 1))
    y = jax.lax.conv_general_dilated(x, w_hwio, (1, 1), ((2, 2), (2, 2)),
                                     lhs_dilation=(2, 2),
                                     dimension_numbers=("NHWC", "HWIO", "NHWC"))
    y = jnp.maximum(_bn_ref(y, p["gamma"], p["beta"]), 0.0)
    if p["sigmoid"]:
        y = jax.nn.sigmoid(y)
    return y


def _unet_reference(x_nchw, params):
    x = jnp.transpose(x_nchw, (0, 2, 3, 1))
    feats = []
    for p in params["down"]:
        x = _down_ref(x, p)
        feats.append(x)

    def run_up(blocks):
        h = feats[-1]
        for i, p in enumerate(blocks):
            h = _up_ref(h, p)
            if i < len(feats) - 1:
                h = jnp.concatenate([h, feats[-2 - i]], axis=-1)
        return h

    return (jnp.transpose(run_up(params["up_ct"]), (0, 3, 1, 2)),
            jnp.transpose(run_up(params["up_mask"]), (0, 3, 1, 2)))


# ------------------------------------ main ----------------------------------

if __name__ == "__main__":
    # UnetGenerator(input_nc=4, output_nc=2, num_downs=3, ngf=8, use_dropout=False)
    N, input_nc, H, W = 2, 4, 16, 16
    output_nc, num_downs, ngf = 2, 3, 8

    keys = iter(jax.random.split(jax.random.PRNGKey(0), 64))

    def nrm(shape, scale=0.05):
        return scale * jax.random.normal(next(keys), shape, dtype=jnp.float32)

    x = jax.random.normal(next(keys), (N, input_nc, H, W), dtype=jnp.float32)

    params = {"down": [], "up_ct": [], "up_mask": []}
    for i in range(num_downs):
        cin = input_nc if i == 0 else ngf * 2 ** (i - 1)
        cout = ngf * 2 ** i
        normalize = (i != num_downs - 1)            # last down block: normalize=False
        p = {"w": nrm((cout, cin, 4, 4)), "normalize": normalize}
        if normalize:
            p["gamma"] = 1.0 + nrm((cout,), 0.1)
            p["beta"] = nrm((cout,), 0.1)
        else:
            p["bias"] = nrm((cout,))
        params["down"].append(p)

    for i in reversed(range(num_downs)):
        cin = ngf * 2 ** i if i == num_downs - 1 else ngf * 2 ** (i + 1)
        cout = ngf * 2 ** (i - 1) if i > 0 else output_nc
        for name in ("up_ct", "up_mask"):
            params[name].append({
                "w": nrm((cin, cout, 4, 4)),
                "gamma": 1.0 + nrm((cout,), 0.1),
                "beta": nrm((cout,), 0.1),
                "sigmoid": (name == "up_mask" and i == 0),
            })

    ct, mask = unet_generator_forward(x, params)
    ct, mask = jax.block_until_ready((ct, mask))

    ct_ref, mask_ref = _unet_reference(x, params)
    assert ct.shape == (N, output_nc, H, W), ct.shape
    assert mask.shape == (N, output_nc, H, W), mask.shape
    assert jnp.allclose(ct, ct_ref, atol=2e-3, rtol=2e-3), \
        float(jnp.max(jnp.abs(ct - ct_ref)))
    assert jnp.allclose(mask, mask_ref, atol=2e-3, rtol=2e-3), \
        float(jnp.max(jnp.abs(mask - mask_ref)))

    print("KERNEL_OK")
</pallas_src>

<mosaic_0001>
module attributes {stable_mosaic.version = 11 : i64} {
  func.func @_matmul_stats_kernel(%arg0: i32, %arg1: i32, %arg2: memref<1x128x64xf32, #tpu.memory_space<vmem>>, %arg3: memref<1x64x128xf32, #tpu.memory_space<vmem>>, %arg4: memref<1x128x128xf32, #tpu.memory_space<vmem>>, %arg5: memref<1x1x1x128xf32, #tpu.memory_space<vmem>>, %arg6: memref<1x1x1x128xf32, #tpu.memory_space<vmem>>) attributes {dimension_semantics = [#tpu.dimension_semantics<parallel>, #tpu.dimension_semantics<parallel>], iteration_bounds = array<i64: 1, 1>, scalar_prefetch = 0 : i64, scratch_operands = 0 : i64, tpu.core_type = #tpu.core_type<tc>, window_params = [{transform_indices = @transform_0, window_bounds = array<i64: 1, 128, 64>}, {transform_indices = @transform_1, window_bounds = array<i64: 1, 64, 128>}, {transform_indices = @transform_2, window_bounds = array<i64: 1, 128, 128>}, {transform_indices = @transform_3, window_bounds = array<i64: 1, 1, 1, 128>}, {transform_indices = @transform_4, window_bounds = array<i64: 1, 1, 1, 128>}]} {
    %c0 = arith.constant 0 : index
    %c0_0 = arith.constant 0 : index
    %c0_1 = arith.constant 0 : index
    %0 = vector.load %arg2[%c0, %c0_0, %c0_1] : memref<1x128x64xf32, #tpu.memory_space<vmem>>, vector<1x128x64xf32>
    %1 = vector.shape_cast %0 : vector<1x128x64xf32> to vector<128x64xf32>
    %c0_2 = arith.constant 0 : index
    %c0_3 = arith.constant 0 : index
    %c0_4 = arith.constant 0 : index
    %2 = vector.load %arg3[%c0_2, %c0_3, %c0_4] : memref<1x64x128xf32, #tpu.memory_space<vmem>>, vector<1x64x128xf32>
    %3 = vector.shape_cast %2 : vector<1x64x128xf32> to vector<64x128xf32>
    %cst = arith.constant dense<0.000000e+00> : vector<128x128xf32>
    %4 = tpu.matmul %1, %3, %cst {dimension_numbers = #tpu.dot_dimension_numbers<[1], [0], [0], [1], [0, 0, 1, 1], [], []>} : vector<128x64xf32>, vector<64x128xf32>, vector<128x128xf32> -> vector<128x128xf32>
    %c0_5 = arith.constant 0 : index
    %c0_6 = arith.constant 0 : index
    %c0_7 = arith.constant 0 : index
    %5 = vector.load %arg4[%c0_5, %c0_6, %c0_7] : memref<1x128x128xf32, #tpu.memory_space<vmem>>, vector<1x128x128xf32>
    %6 = vector.shape_cast %5 : vector<1x128x128xf32> to vector<128x128xf32>
    %7 = vector.shape_cast %4 : vector<128x128xf32> to vector<1x128x128xf32>
    tpu.vector_store %arg4[%c0_5, %c0_6, %c0_7], %7 {strides = array<i32>} : memref<1x128x128xf32, #tpu.memory_space<vmem>>, vector<1x128x128xf32>,
    %cst_8 = arith.constant dense<0.000000e+00> : vector<128xf32>
    %8 = vector.multi_reduction <add>, %4, %cst_8 [0] : vector<128x128xf32> to vector<128xf32>
    %9 = vector.shape_cast %8 : vector<128xf32> to vector<1x128xf32>
    %c0_9 = arith.constant 0 : index
    %c0_10 = arith.constant 0 : index
    %c0_11 = arith.constant 0 : index
    %c0_12 = arith.constant 0 : index
    %10 = vector.load %arg5[%c0_9, %c0_10, %c0_11, %c0_12] : memref<1x1x1x128xf32, #tpu.memory_space<vmem>>, vector<1x1x1x128xf32>
    %11 = vector.shape_cast %10 : vector<1x1x1x128xf32> to vector<1x128xf32>
    %12 = vector.shape_cast %9 : vector<1x128xf32> to vector<1x1x1x128xf32>
    tpu.vector_store %arg5[%c0_9, %c0_10, %c0_11, %c0_12], %12 {strides = array<i32>} : memref<1x1x1x128xf32, #tpu.memory_space<vmem>>, vector<1x1x1x128xf32>,
    %13 = arith.mulf %4, %4 : vector<128x128xf32>
    %cst_13 = arith.constant dense<0.000000e+00> : vector<128xf32>
    %14 = vector.multi_reduction <add>, %13, %cst_13 [0] : vector<128x128xf32> to vector<128xf32>
    %15 = vector.shape_cast %14 : vector<128xf32> to vector<1x128xf32>
    %c0_14 = arith.constant 0 : index
    %c0_15 = arith.constant 0 : index
    %c0_16 = arith.constant 0 : index
    %c0_17 = arith.constant 0 : index
    %16 = vector.load %arg6[%c0_14, %c0_15, %c0_16, %c0_17] : memref<1x1x1x128xf32, #tpu.memory_space<vmem>>, vector<1x1x1x128xf32>
    %17 = vector.shape_cast %16 : vector<1x1x1x128xf32> to vector<1x128xf32>
    %18 = vector.shape_cast %15 : vector<1x128xf32> to vector<1x1x1x128xf32>
    tpu.vector_store %arg6[%c0_14, %c0_15, %c0_16, %c0_17], %18 {strides = array<i32>} : memref<1x1x1x128xf32, #tpu.memory_space<vmem>>, vector<1x1x1x128xf32>,
    return
  }
  func.func @transform_0(%arg0: i32, %arg1: i32) -> (i32, i32, i32) {
    %c0_i32 = arith.constant 0 : i32
    %c0_i32_0 = arith.constant 0 : i32
    return %arg0, %arg1, %c0_i32 : i32, i32, i32
  }
  func.func @transform_1(%arg0: i32, %arg1: i32) -> (i32, i32, i32) {
    %c0_i32 = arith.constant 0 : i32
    %c0_i32_0 = arith.constant 0 : i32
    %c0_i32_1 = arith.constant 0 : i32
    return %arg0, %c0_i32, %c0_i32_0 : i32, i32, i32
  }
  func.func @transform_2(%arg0: i32, %arg1: i32) -> (i32, i32, i32) {
    %c0_i32 = arith.constant 0 : i32
    %c0_i32_0 = arith.constant 0 : i32
    return %arg0, %arg1, %c0_i32 : i32, i32, i32
  }
  func.func @transform_3(%arg0: i32, %arg1: i32) -> (i32, i32, i32, i32) {
    %c0_i32 = arith.constant 0 : i32
    %c0_i32_0 = arith.constant 0 : i32
    %c0_i32_1 = arith.constant 0 : i32
    return %arg0, %arg1, %c0_i32, %c0_i32_0 : i32, i32, i32, i32
  }
  func.func @transform_4(%arg0: i32, %arg1: i32) -> (i32, i32, i32, i32) {
    %c0_i32 = arith.constant 0 : i32
    %c0_i32_0 = arith.constant 0 : i32
    %c0_i32_1 = arith.constant 0 : i32
    return %arg0, %arg1, %c0_i32, %c0_i32_0 : i32, i32, i32, i32
  }
}

</mosaic_0001>

<bundles_post_ra>
// kernel: tpu_custom_call.1
= control target key start
LH: loop header
LB: loop body
LE: loop exit
PB: predicated region body
PF: predicated region fallthrough
CT: control target
= control target key end

     0   :  { %10 = vsyncpa [#allocation3], 0  ;;  %vm40_vm0 = vcmask 523264   ;;  %s719_s0 = inlined_call_operand.vmem [shape: f32[1,128,64], index: 0, kind: input, shape index: {}]   ;;  %s720_s1 = inlined_call_operand.vmem [shape: f32[1,64,128], index: 1, kind: input, shape index: {}]   ;;  %s721_s2 = inlined_call_operand.hbm [shape: f32[1,128,128], index: 2, kind: output, shape index: {0}]   ;;  %s722_s3 = inlined_call_operand.hbm [shape: f32[1,1,1,128], index: 3, kind: output, shape index: {1}]   ;;  %s723_s4 = inlined_call_operand.hbm [shape: f32[1,1,1,128], index: 4, kind: output, shape index: {2}]  }
   0x1   :  { %v32_v0 = vld [vmem:[%s720_s1] sm:$0xff]  ;;  %v33_v1 = vld [vmem:[%s720_s1 + $0x8] sm:$0xff]  ;;  %v34_v2 = vld [vmem:[%s720_s1 + $0x10] sm:$0xff] }
   0x2   :  { %v433_v3 = vpack.c.bf16 %v33_v1, %v32_v0  ;;  %v35_v4 = vld [vmem:[%s720_s1 + $0x18] sm:$0xff]  ;;  %v36_v6 = vld [vmem:[%s720_s1 + $0x20] sm:$0xff]  ;;  %v37_v7 = vld [vmem:[%s720_s1 + $0x28] sm:$0xff] }
   0x3   :  { %v437_v5 = vpack.c.bf16 %v35_v4, %v34_v2  ;;  %v16_v8 = vld [vmem:[%s719_s0] sm:$0xff]  ;;  %v441_v9 = vpack.c.bf16 %v37_v7, %v36_v6  ;;  %v38_v11 = vld [vmem:[%s720_s1 + $0x30] sm:$0xff]  ;;  %v39_v12 = vld [vmem:[%s720_s1 + $0x38] sm:$0xff] }
   0x4   :  { %434 = vmatprep.subr.bf16.mxu0 %v433_v3  ;;  %449 = vmatprep.subr.bf16.mxu1 %v433_v3  ;;  %v24_v10 = vld [vmem:[%s719_s0 + $0x40] sm:$0xff] }
   0x5   :  { %436 = vmatpush3.bf16.msra.mxu0 %v433_v3  ;;  %409 = vmatprep.mubr.msk.f32.mxu0 %vm40_vm0, %v16_v8 }
   0x6   :  { %438 = vmatprep.subr.bf16.mxu0 %v437_v5  ;;  %453 = vmatpush3.bf16.msra.mxu1 %v433_v3 }
   0x7   :  { %450 = vmatprep.subr.bf16.mxu1 %v437_v5  ;;  %421 = vmatprep.mubr.msk.f32.mxu1 %vm40_vm0, %v24_v10 }
   0x9   :  { %440 = vmatpush3.bf16.msra.mxu0 %v437_v5 }
   0xa   :  { %11 = vsyncpa [#allocation5], 0  ;;  %442 = vmatprep.subr.bf16.mxu0 %v441_v9  ;;  %v445_v13 = vpack.c.bf16 %v39_v12, %v38_v11  ;;  %454 = vmatpush3.bf16.msra.mxu1 %v437_v5  ;;  %v17_v14 = vld [vmem:[%s719_s0 + $0x8] sm:$0xff]  ;;  %v18_v15 = vld [vmem:[%s719_s0 + $0x10] sm:$0xff] }
   0xb   :  { %451 = vmatprep.subr.bf16.mxu1 %v441_v9  ;;  %v25_v16 = vld [vmem:[%s719_s0 + $0x48] sm:$0xff]  ;;  %v26_v17 = vld [vmem:[%s719_s0 + $0x50] sm:$0xff]  ;;  %v19_v18 = vld [vmem:[%s719_s0 + $0x18] sm:$0xff] }
   0xc   :  { %v20_v19 = vld [vmem:[%s719_s0 + $0x20] sm:$0xff]  ;;  %v27_v20 = vld [vmem:[%s719_s0 + $0x58] sm:$0xff]  ;;  %v21_v22 = vld [vmem:[%s719_s0 + $0x28] sm:$0xff] }
   0xd   :  { %444 = vmatpush3.bf16.msra.mxu0 %v441_v9  ;;  %v28_v21 = vld [vmem:[%s719_s0 + $0x60] sm:$0xff]  ;;  %v22_v23 = vld [vmem:[%s719_s0 + $0x30] sm:$0xff]  ;;  %v29_v24 = vld [vmem:[%s719_s0 + $0x68] sm:$0xff] }
   0xe   :  { %446 = vmatprep.subr.bf16.mxu0 %v445_v13  ;;  %455 = vmatpush3.bf16.msra.mxu1 %v441_v9  ;;  %v30_v25 = vld [vmem:[%s719_s0 + $0x70] sm:$0xff]  ;;  %v23_v26 = vld [vmem:[%s719_s0 + $0x38] sm:$0xff] }
   0xf   :  { %452 = vmatprep.subr.bf16.mxu1 %v445_v13  ;;  %v31_v27 = vld [vmem:[%s719_s0 + $0x78] sm:$0xff]  ;;  %s532_s0 = smov [#allocation2]  }
  0x10   :  { %s315_s10 = sshll.u32 %s532_s0, 4  ;;  %s659_s10 = int_to_ptr.vmem [resolvable:$true] %s315_s10 }
  0x11   :  { %448 = vmatpush3.bf16.msra.mxu0 %v445_v13  ;;  %s462_s11 = scalar_lea.vmem %s659_s10, 2048  ;;  %p467_p1 = scmp.lt.s32.totalorder %s659_s10, %s659_s10 }
  0x12   :  { %456 = vmatpush3.bf16.msra.mxu1 %v445_v13  ;;  %p463_p0 = scmp.ne.s32.totalorder %s659_s10, %s462_s11  ;;  %p468_p2 = scmp.lt.s32.totalorder %s462_s11, %s462_s11 }
  0x14   :  { %410 = vmatmul.mubr.msk.f32.vlgmr.msra.gmra.mrb[0].mxu0 %vm40_vm0, %v17_v14  ;;  %p469_p3 = por %p468_p2, %p467_p1 }
  0x15   :  { %412 = vmatprep.mubr.msk.f32.mxu0 %vm40_vm0, %v18_v15  ;;  %422 = vmatmul.mubr.msk.f32.vlgmr.msra.gmra.mrb[0].mxu1 %vm40_vm0, %v25_v16 }
  0x16   :  { %424 = vmatprep.mubr.msk.f32.mxu1 %vm40_vm0, %v26_v17  ;;  %p470_p4 = pnand %p469_p3, %p463_p0 }
  0x18   :  { %413 = vmatmul.mubr.msk.f32.gmra.mrb[2].mxu0 %vm40_vm0, %v19_v18 }
  0x19   :  { %415 = vmatprep.mubr.msk.f32.mxu0 %vm40_vm0, %v20_v19  ;;  %425 = vmatmul.mubr.msk.f32.gmra.mrb[2].mxu1 %vm40_vm0, %v27_v20 }
  0x1a   :  { %427 = vmatprep.mubr.msk.f32.mxu1 %vm40_vm0, %v28_v21 }
  0x1c   :  { %416 = vmatmul.mubr.msk.f32.gmra.mrb[4].mxu0 %vm40_vm0, %v21_v22 }
  0x1d   :  { %418 = vmatprep.mubr.msk.f32.mxu0 %vm40_vm0, %v22_v23  ;;  %428 = vmatmul.mubr.msk.f32.gmra.mrb[4].mxu1 %vm40_vm0, %v29_v24 }
  0x1e   :  { %430 = vmatprep.mubr.msk.f32.mxu1 %vm40_vm0, %v30_v25 }
  0x20   :  { %419 = vmatmul.mubr.msk.f32.gmra.mrb[6].mxu0 %vm40_vm0, %v23_v26 }
  0x21   :  { %431 = vmatmul.mubr.msk.f32.gmra.mrb[6].mxu1 %vm40_vm0, %v31_v27 }
  0xe7   :  { %v411_v28 = vpop.f32.mrb[0].mxu0 }
  0xe8   :  { %235 = vst [vmem:[#allocation2 + $0x8] sm:$0xff] %v411_v28  ;;  %v273_v29 = vmul.f32 %v411_v28, %v411_v28  ;;  %v155_v30 = vpop.f32.mrb[1].mxu0  ;;  %v650_v31 = vpop.f32.mrb[0].mxu1 }
  0xe9   :  { %234 = vst [vmem:[#allocation2] sm:$0xff] %v155_v30  ;;  %v250_v32 = vadd.f32 %v411_v28, %v155_v30  ;;  %v272_v33 = vmul.f32 %v155_v30, %v155_v30  ;;  %243 = vst [vmem:[#allocation2 + $0x48] sm:$0xff] %v650_v31  ;;  %v653_v34 = vpop.f32.mrb[1].mxu1 }
  0xea   :  { %242 = vst [vmem:[#allocation2 + $0x40] sm:$0xff] %v653_v34  ;;  %v280_v1 = vmul.f32 %v653_v34, %v653_v34 }
  0xeb   :  { %v288_v35 = vadd.f32 %v273_v29, %v272_v33  ;;  %v414_v36 = vpop.f32.mrb[2].mxu0 }
  0xec   :  { %237 = vst [vmem:[#allocation2 + $0x18] sm:$0xff] %v414_v36  ;;  %v165_v37 = vpop.f32.mrb[3].mxu0  ;;  %v656_v38 = vpop.f32.mrb[2].mxu1  ;;  %v275_v42 = vmul.f32 %v414_v36, %v414_v36 }
  0xed   :  { %236 = vst [vmem:[#allocation2 + $0x10] sm:$0xff] %v165_v37  ;;  %v251_v39 = vadd.f32 %v250_v32, %v165_v37  ;;  %v274_v40 = vmul.f32 %v165_v37, %v165_v37  ;;  %245 = vst [vmem:[#allocation2 + $0x58] sm:$0xff] %v656_v38  ;;  %v205_v41 = vpop.f32.mrb[3].mxu1 }
  0xee   :  { %244 = vst [vmem:[#allocation2 + $0x50] sm:$0xff] %v205_v41 }
  0xef   :  { %v289_v43 = vadd.f32 %v288_v35, %v274_v40  ;;  %v417_v44 = vpop.f32.mrb[4].mxu0  ;;  %v252_v45 = vadd.f32 %v414_v36, %v251_v39 }
  0xf0   :  { %239 = vst [vmem:[#allocation2 + $0x28] sm:$0xff] %v417_v44  ;;  %v175_v46 = vpop.f32.mrb[5].mxu0  ;;  %v429_v47 = vpop.f32.mrb[4].mxu1  ;;  %v277_v52 = vmul.f32 %v417_v44, %v417_v44 }
  0xf1   :  { %238 = vst [vmem:[#allocation2 + $0x20] sm:$0xff] %v175_v46  ;;  %v253_v48 = vadd.f32 %v252_v45, %v175_v46  ;;  %v276_v49 = vmul.f32 %v175_v46, %v175_v46  ;;  %v290_v50 = vadd.f32 %v289_v43, %v275_v42  ;;  %247 = vst [vmem:[#allocation2 + $0x68] sm:$0xff] %v429_v47  ;;  %v215_v51 = vpop.f32.mrb[5].mxu1 }
  0xf2   :  { %246 = vst [vmem:[#allocation2 + $0x60] sm:$0xff] %v215_v51 }
  0xf3   :  { %v291_v53 = vadd.f32 %v290_v50, %v276_v49  ;;  %v420_v54 = vpop.f32.mrb[6].mxu0  ;;  %v254_v55 = vadd.f32 %v417_v44, %v253_v48 }
  0xf4   :  { %241 = vst [vmem:[#allocation2 + $0x38] sm:$0xff] %v420_v54  ;;  %v185_v56 = vpop.f32.mrb[7].mxu0  ;;  %v432_v57 = vpop.f32.mrb[6].mxu1  ;;  %v279_v62 = vmul.f32 %v420_v54, %v420_v54 }
  0xf5   :  { %240 = vst [vmem:[#allocation2 + $0x30] sm:$0xff] %v185_v56  ;;  %v255_v58 = vadd.f32 %v254_v55, %v185_v56  ;;  %v278_v59 = vmul.f32 %v185_v56, %v185_v56  ;;  %v292_v60 = vadd.f32 %v291_v53, %v277_v52  ;;  %249 = vst [vmem:[#allocation2 + $0x78] sm:$0xff] %v432_v57  ;;  %v225_v61 = vpop.f32.mrb[7].mxu1 }
  0xf6   :  { %248 = vst [vmem:[#allocation2 + $0x70] sm:$0xff] %v225_v61 }
  0xf7   :  { %v256_v63 = vadd.f32 %v420_v54, %v255_v58  ;;  %v293_v0 = vadd.f32 %v292_v60, %v278_v59 }
  0xf8   :  { %473 = shalt.err (!%p470_p4)
}
  0xf9   :  { %s474_s13 = scalar_lea.hbm %s721_s2, 2048 }
  0xfa   :  { %p475_p5 = scmp.ne.s32.totalorder %s721_s2, %s474_s13  ;;  %p478_p6 = scmp.lt.u32.totalorder %s474_s13, %s721_s2 }
  0xfc   :  { %p480_p7 = pnand %p478_p6, %p475_p5 }
  0xfe   :  { %483 = shalt.err (!%p480_p7)
}
  0xff   :  { %s533_s18 = smov 128   ;;  %s534_s19 = smov 8   ;;  %v294_v2 = vadd.f32 %v293_v0, %v279_v62  ;;  %v257_v3 = vadd.f32 %v256_v63, %v653_v34  ;;  %v281_v4 = vmul.f32 %v650_v31, %v650_v31  ;;  %v282_v7 = vmul.f32 %v205_v41, %v205_v41 }
 0x100   :  { %321 = dma.vmem_to_hbm [thread:$0]  %s659_s10, 2048, %s721_s2, [#allocation3], %s533_s18, %s533_s18, %s534_s19   ;;  %v283_v10 = vmul.f32 %v656_v38, %v656_v38  ;;  %v284_v13 = vmul.f32 %v215_v51, %v215_v51  ;;  %v285_v16 = vmul.f32 %v429_v47, %v429_v47  ;;  %v286_v19 = vmul.f32 %v225_v61, %v225_v61 }
 0x101   :  { %v295_v5 = vadd.f32 %v294_v2, %v280_v1  ;;  %v258_v6 = vadd.f32 %v650_v31, %v257_v3  ;;  %v287_v22 = vmul.f32 %v432_v57, %v432_v57  ;;  %s535_s2 = smov [#allocation4]   ;;  %s536_s23 = smov [#allocation6]  }
 0x102   :  { %s328_s22 = sshll.u32 %s535_s2, 4  ;;  %s338_s24 = sshll.u32 %s536_s23, 4  ;;  %s329_s22 = int_to_ptr.vmem [resolvable:$true] %s328_s22  ;;  %s687_s24 = int_to_ptr.vmem [resolvable:$true] %s338_s24 }
 0x103   :  { %v259_v8 = vadd.f32 %v258_v6, %v205_v41  ;;  %v296_v9 = vadd.f32 %v295_v5, %v281_v4  ;;  %s484_s25 = scalar_lea.vmem %s329_s22, 16  ;;  %s488_s26 = scalar_lea.vmem %s329_s22, 32 }
 0x104   :  { %p485_p8 = scmp.ne.s32.totalorder %s329_s22, %s484_s25  ;;  %p489_p9 = scmp.lt.s32.totalorder %s329_s22, %s329_s22 }
 0x105   :  { %v297_v11 = vadd.f32 %v296_v9, %v282_v7  ;;  %v260_v12 = vadd.f32 %v656_v38, %v259_v8  ;;  %p490_p10 = scmp.lt.s32.totalorder %s488_s26, %s484_s25 }
 0x107   :  { %v261_v14 = vadd.f32 %v260_v12, %v215_v51  ;;  %v298_v15 = vadd.f32 %v297_v11, %v283_v10  ;;  %p491_p11 = por %p490_p10, %p489_p9 }
 0x109   :  { %v299_v17 = vadd.f32 %v298_v15, %v284_v13  ;;  %v262_v18 = vadd.f32 %v429_v47, %v261_v14  ;;  %p492_p12 = pnand %p491_p11, %p485_p8 }
 0x10b   :  { %v263_v20 = vadd.f32 %v262_v18, %v225_v61  ;;  %v300_v21 = vadd.f32 %v299_v17, %v285_v16 }
 0x10d   :  { %v264_v23 = vadd.f32 %v432_v57, %v263_v20  ;;  %v301_v24 = vadd.f32 %v300_v21, %v286_v19 }
 0x10f   :  { %v265_v25 = vrot.slane %v264_v23, 4  ;;  %v302_v26 = vadd.f32 %v301_v24, %v287_v22 }
 0x111   :  { %v266_v27 = vadd.f32 %v265_v25, %v264_v23  ;;  %v303_v28 = vrot.slane %v302_v26, 4 }
 0x113   :  { %v267_v29 = vrot.slane %v266_v27, 2  ;;  %v304_v30 = vadd.f32 %v303_v28, %v302_v26 }
 0x115   :  { %v268_v31 = vadd.f32 %v267_v29, %v266_v27  ;;  %v305_v32 = vrot.slane %v304_v30, 2 }
 0x117   :  { %v269_v33 = vrot.slane %v268_v31, 1  ;;  %v306_v34 = vadd.f32 %v305_v32, %v304_v30 }
 0x119   :  { %v270_v35 = vadd.f32 %v269_v33, %v268_v31  ;;  %v307_v36 = vrot.slane %v306_v34, 1 }
 0x11b   :  { %271 = vst [vmem:[#allocation4] sm:$0x1] %v270_v35  ;;  %v308_v37 = vadd.f32 %v307_v36, %v306_v34 }
 0x11c   :  { %495 = shalt.err (!%p492_p12)
}
 0x11d   :  { %s496_s29 = scalar_lea.hbm %s722_s3, 16 }
 0x11e   :  { %p497_p13 = scmp.ne.s32.totalorder %s722_s3, %s496_s29  ;;  %p500_p0 = scmp.lt.u32.totalorder %s496_s29, %s722_s3 }
 0x120   :  { %p502_p1 = pnand %p500_p0, %p497_p13 }
 0x122   :  { %505 = shalt.err (!%p502_p1)
}
 0x123   :  { %331 = dma.vmem_to_hbm [thread:$0]  %s329_s22, 16, %s722_s3, [#allocation5]   ;;  %309 = vst [vmem:[#allocation6] sm:$0x1] %v308_v37 }
 0x124   :  { %s506_s0 = scalar_lea.vmem %s687_s24, 16  ;;  %s510_s10 = scalar_lea.vmem %s687_s24, 32 }
 0x125   :  { %p507_p2 = scmp.ne.s32.totalorder %s687_s24, %s506_s0  ;;  %p511_p3 = scmp.lt.s32.totalorder %s687_s24, %s687_s24 }
 0x126   :  { %p512_p4 = scmp.lt.s32.totalorder %s510_s10, %s506_s0 }
 0x128   :  { %p513_p5 = por %p512_p4, %p511_p3 }
 0x12a   :  { %p514_p6 = pnand %p513_p5, %p507_p2 }
 0x12c   :  { %517 = shalt.err (!%p514_p6)
}
 0x12d   :  { %s518_s12 = scalar_lea.hbm %s723_s4, 16 }
 0x12e   :  { %p519_p7 = scmp.ne.s32.totalorder %s723_s4, %s518_s12  ;;  %p522_p8 = scmp.lt.u32.totalorder %s518_s12, %s723_s4 }
 0x130   :  { %p524_p9 = pnand %p522_p8, %p519_p7 }
 0x132   :  { %527 = shalt.err (!%p524_p9)
}
 0x133   :  { %341 = dma.vmem_to_hbm [thread:$0]  %s687_s24, 16, %s723_s4, [#allocation5]  }
 0x134   :  { %528 = dma.done.wait [#allocation3], 2048  }
 0x135   :  { %529 = vsyncadd [#allocation3], 4294965248 }
 0x136   :  { %530 = dma.done.wait [#allocation5], 32  }
 0x137   :  { %531 = vsyncadd [#allocation5], 4294967264 }
 0x138   :  { %351 = vsyncpa [#allocation3], 1 }
 0x139   :  { %352 = vsyncpa [#allocation5], 1 }

</bundles_post_ra>
